<compile_context>
chip_gen: v6e
topology: v6e:2x2x1
jax: 0.10.0
libtpu: 0.0.40
codegen_flags: <defaults>
</compile_context>

<pallas_src>
import numpy as np
import jax
import jax.numpy as jnp
from jax.experimental import pallas as pl
from jax.experimental.pallas import tpu as pltpu

BN_EPS = 1e-5
_VMEM_LIMIT = 48 * 1024 * 1024   # explicit; safe on v5e/v6e (128 MiB) and v7x (64 MiB)


# --------------------------------------------------------------------------
# Kernel 1: fused  conv1x1+BN (g) , conv1x1-stride2+BN (x) , ReLU,
#                  conv1x1+BN -> sigmoid  ==> low-res attention map psi.
# Pixels live on the lane axis; channels contract on the MXU.
# --------------------------------------------------------------------------
def _attn_map_kernel(g_ref, xs_ref, wg_ref, wx_ref, bgx_ref, wp_ref, bp_ref,
                     o_ref):
    g = g_ref[0]                                     # (Fg, TP)
    xs = xs_ref[0]                                   # (Fl, TP)
    acc = jnp.dot(wg_ref[...], g, preferred_element_type=jnp.float32)
    acc = acc + jnp.dot(wx_ref[...], xs, preferred_element_type=jnp.float32)
    a = jnp.maximum(acc + bgx_ref[...], 0.0)         # fused bias + ReLU
    s = jnp.dot(wp_ref[...], a,
                preferred_element_type=jnp.float32) + bp_ref[...]
    o_ref[0] = 1.0 / (1.0 + jnp.exp(-s))             # Sigmoid, (1, TP) lane-dense


# --------------------------------------------------------------------------
# Kernel 2: bilinear 2x upsample of psi (R @ psi @ C^T) + elementwise gating.
# One (batch, channel-tile) block per grid step; single broadcast multiply.
# --------------------------------------------------------------------------
def _upsample_gate_kernel(psi_ref, r_ref, ct_ref, x_ref, o_ref):
    p = psi_ref[0]                                                       # (h, w)
    rows = jnp.dot(r_ref[...], p, preferred_element_type=jnp.float32)    # (H, w)
    up = jnp.dot(rows, ct_ref[...], preferred_element_type=jnp.float32)  # (H, W)
    o_ref[0] = x_ref[0] * up[None, :, :]             # (C_TILE, H, W) vectorized


# --------------------------------------------------------------------------
# Helpers
# --------------------------------------------------------------------------
def _bilinear_matrix(out_size, in_size):
    """Row-interp matrix for bilinear resize, half-pixel centers
    (PyTorch nn.Upsample(mode='bilinear', align_corners=False))."""
    i = np.arange(out_size, dtype=np.float64)
    src = (i + 0.5) * (in_size / out_size) - 0.5
    src = np.clip(src, 0.0, in_size - 1)
    i0 = np.floor(src).astype(np.int64)
    i1 = np.minimum(i0 + 1, in_size - 1)
    frac = src - i0
    m = np.zeros((out_size, in_size), dtype=np.float32)
    m[np.arange(out_size), i0] += (1.0 - frac).astype(np.float32)
    m[np.arange(out_size), i1] += frac.astype(np.float32)
    return m


def _fold_conv_bn(w, b, bn_params):
    """Fold eval-mode BatchNorm into the 1x1 conv (exact); keep (Cout, Cin)."""
    gamma, beta, mean, var = bn_params
    scale = gamma / jnp.sqrt(var + BN_EPS)
    w_f = w * scale[:, None]                 # (Cout, Cin)
    b_f = (b - mean) * scale + beta          # (Cout,)
    return w_f, b_f


def _pick_pixel_tile(hw, max_tile=1024):
    """Largest multiple-of-128 divisor of hw (<= max_tile); fall back to the
    full extent (single per-batch pixel block) if none exists."""
    best = None
    t = 128
    while t <= min(hw, max_tile):
        if hw % t == 0:
            best = t
        t += 128
    return best if best is not None else hw


def _pick_channel_tile(Fl, H, W, budget_bytes=12 << 20):
    """Largest divisor of Fl whose (x + out) double-buffered blocks fit the
    VMEM budget (sized to be safe on v7x's 64 MiB physical VMEM)."""
    per_chan = H * W * 4                      # f32 bytes per channel plane
    max_c = max(1, budget_bytes // (4 * per_chan))   # x+out, double-buffered
    best = 1
    for c in range(1, Fl + 1):
        if Fl % c == 0 and c <= max_c:
            best = c
    return best


# --------------------------------------------------------------------------
# Forward pass (wrapper): free NCHW views + two pallas_calls
# --------------------------------------------------------------------------
def attention_block_forward(g, x, params):
    N, Fg, h, w = g.shape
    _, Fl, H, W = x.shape
    assert (H, W) == (2 * h, 2 * w)
    F_int = params["wg"].shape[0]

    # Fold BN (eval mode) into the 1x1 convs; fuse the two additive biases.
    wg_f, bg_f = _fold_conv_bn(params["wg"], params["bg"], params["bn_g"])
    wx_f, bx_f = _fold_conv_bn(params["wx"], params["bx"], params["bn_x"])
    wp_f, bp_f = _fold_conv_bn(params["wp"], params["bp"], params["bn_p"])
    bgx = (bg_f + bx_f).reshape(F_int, 1)     # single fused bias, broadcast on lanes
    bp2 = bp_f.reshape(1, 1)

    # Low-res inputs, NCHW kept; pixels flattened onto the lane axis (free views,
    # no NHWC transpose passes).  Stride-2 1x1 conv == spatial subsample.
    hw = h * w
    g_flat = g.reshape(N, Fg, hw)
    xs_flat = x[:, :, ::2, ::2].reshape(N, Fl, hw)

    TP = _pick_pixel_tile(hw)

    psi_flat = pl.pallas_call(
        _attn_map_kernel,
        out_shape=jax.ShapeDtypeStruct((N, 1, hw), jnp.float32),
        grid_spec=pltpu.PrefetchScalarGridSpec(
            num_scalar_prefetch=0,
            grid=(N, hw // TP),
            in_specs=[
                pl.BlockSpec((1, Fg, TP), lambda n, p: (n, 0, p)),
                pl.BlockSpec((1, Fl, TP), lambda n, p: (n, 0, p)),
                pl.BlockSpec((F_int, Fg), lambda n, p: (0, 0)),
                pl.BlockSpec((F_int, Fl), lambda n, p: (0, 0)),
                pl.BlockSpec((F_int, 1), lambda n, p: (0, 0)),
                pl.BlockSpec((1, F_int), lambda n, p: (0, 0)),
                pl.BlockSpec((1, 1), lambda n, p: (0, 0)),
            ],
            out_specs=pl.BlockSpec((1, 1, TP), lambda n, p: (n, 0, p)),
        ),
        compiler_params=pltpu.CompilerParams(
            dimension_semantics=("parallel", "parallel"),
            vmem_limit_bytes=_VMEM_LIMIT),
    )(g_flat, xs_flat, wg_f, wx_f, bgx, wp_f, bp2)

    psi_low = psi_flat.reshape(N, h, w)

    # Bilinear-upsample interpolation matrices (deterministic constants).
    R = jnp.asarray(_bilinear_matrix(H, h))          # (H, h)
    Ct = jnp.asarray(_bilinear_matrix(W, w)).T       # (w, W)

    C_TILE = _pick_channel_tile(Fl, H, W)

    out = pl.pallas_call(
        _upsample_gate_kernel,
        out_shape=jax.ShapeDtypeStruct((N, Fl, H, W), x.dtype),
        grid_spec=pltpu.PrefetchScalarGridSpec(
            num_scalar_prefetch=0,
            grid=(N, Fl // C_TILE),
            in_specs=[
                pl.BlockSpec((1, h, w), lambda n, c: (n, 0, 0)),
                pl.BlockSpec((H, h), lambda n, c: (0, 0)),
                pl.BlockSpec((w, W), lambda n, c: (0, 0)),
                pl.BlockSpec((1, C_TILE, H, W), lambda n, c: (n, c, 0, 0)),
            ],
            out_specs=pl.BlockSpec((1, C_TILE, H, W), lambda n, c: (n, c, 0, 0)),
        ),
        compiler_params=pltpu.CompilerParams(
            dimension_semantics=("parallel", "parallel"),
            vmem_limit_bytes=_VMEM_LIMIT),
    )(psi_low, R, Ct, x)

    return out


# --------------------------------------------------------------------------
# Deterministic parameter init (shapes from attentionBlock.__init__)
# --------------------------------------------------------------------------
def init_params(key, Fg, Fl, F_int):
    ks = jax.random.split(key, 9)

    def bn(k, c):
        k1, k2, k3, k4 = jax.random.split(k, 4)
        gamma = 1.0 + 0.1 * jax.random.normal(k1, (c,), jnp.float32)
        beta = 0.1 * jax.random.normal(k2, (c,), jnp.float32)
        mean = 0.1 * jax.random.normal(k3, (c,), jnp.float32)
        var = 0.5 + jax.random.uniform(k4, (c,), jnp.float32)
        return gamma, beta, mean, var

    return {
        "wg": 0.3 * jax.random.normal(ks[0], (F_int, Fg), jnp.float32),
        "bg": 0.1 * jax.random.normal(ks[1], (F_int,), jnp.float32),
        "bn_g": bn(ks[2], F_int),
        "wx": 0.3 * jax.random.normal(ks[3], (F_int, Fl), jnp.float32),
        "bx": 0.1 * jax.random.normal(ks[4], (F_int,), jnp.float32),
        "bn_x": bn(ks[5], F_int),
        "wp": 0.3 * jax.random.normal(ks[6], (1, F_int), jnp.float32),
        "bp": 0.1 * jax.random.normal(ks[7], (1,), jnp.float32),
        "bn_p": bn(ks[8], 1),
    }


# --------------------------------------------------------------------------
# Pure-JAX reference (independent of the kernels) for validation
# --------------------------------------------------------------------------
def reference_forward(g, x, params):
    def conv1x1_bn(inp, wmat, b, bnp, stride):
        gamma, beta, mean, var = bnp
        y = jnp.einsum("nchw,oc->nohw", inp[:, :, ::stride, ::stride], wmat)
        y = y + b[None, :, None, None]
        y = (y - mean[None, :, None, None]) / jnp.sqrt(
            var[None, :, None, None] + BN_EPS)
        return y * gamma[None, :, None, None] + beta[None, :, None, None]

    g1 = conv1x1_bn(g, params["wg"], params["bg"], params["bn_g"], 1)
    x1 = conv1x1_bn(x, params["wx"], params["bx"], params["bn_x"], 2)
    a = jax.nn.relu(g1 + x1)
    s = conv1x1_bn(a, params["wp"], params["bp"], params["bn_p"], 1)
    psi = jax.nn.sigmoid(s)
    N, _, H, W = x.shape
    psi_up = jax.image.resize(psi, (N, 1, H, W), method="bilinear")
    return x * psi_up


if __name__ == "__main__":
    N, Fg, Fl, F_int, H, W = 2, 4, 4, 8, 16, 16
    h, w = H // 2, W // 2

    key = jax.random.PRNGKey(0)
    kg, kx, kp = jax.random.split(key, 3)
    g = jax.random.normal(kg, (N, Fg, h, w), jnp.float32)
    x = jax.random.normal(kx, (N, Fl, H, W), jnp.float32)
    params = init_params(kp, Fg, Fl, F_int)

    out = attention_block_forward(g, x, params)
    jax.block_until_ready(out)

    ref = reference_forward(g, x, params)
    assert out.shape == x.shape
    np.testing.assert_allclose(np.asarray(out), np.asarray(ref),
                               rtol=1e-4, atol=1e-4)
    print("KERNEL_OK")
</pallas_src>

<mosaic_0001>
module attributes {stable_mosaic.version = 11 : i64} {
  func.func @_attn_map_kernel(%arg0: i32, %arg1: i32, %arg2: memref<1x4x64xf32, #tpu.memory_space<vmem>>, %arg3: memref<1x4x64xf32, #tpu.memory_space<vmem>>, %arg4: memref<8x4xf32, #tpu.memory_space<vmem>>, %arg5: memref<8x4xf32, #tpu.memory_space<vmem>>, %arg6: memref<8x1xf32, #tpu.memory_space<vmem>>, %arg7: memref<1x8xf32, #tpu.memory_space<vmem>>, %arg8: memref<1x1xf32, #tpu.memory_space<vmem>>, %arg9: memref<1x1x64xf32, #tpu.memory_space<vmem>>) attributes {dimension_semantics = [#tpu.dimension_semantics<parallel>, #tpu.dimension_semantics<parallel>], iteration_bounds = array<i64: 2, 1>, scalar_prefetch = 0 : i64, scratch_operands = 0 : i64, tpu.core_type = #tpu.core_type<tc>, window_params = [{transform_indices = @transform_0, window_bounds = array<i64: 1, 4, 64>}, {transform_indices = @transform_1, window_bounds = array<i64: 1, 4, 64>}, {pipeline_mode = #tpu.pipeline_mode<synchronous>, transform_indices = @transform_2, window_bounds = array<i64: 8, 4>}, {pipeline_mode = #tpu.pipeline_mode<synchronous>, transform_indices = @transform_3, window_bounds = array<i64: 8, 4>}, {pipeline_mode = #tpu.pipeline_mode<synchronous>, transform_indices = @transform_4, window_bounds = array<i64: 8, 1>}, {pipeline_mode = #tpu.pipeline_mode<synchronous>, transform_indices = @transform_5, window_bounds = array<i64: 1, 8>}, {pipeline_mode = #tpu.pipeline_mode<synchronous>, transform_indices = @transform_6, window_bounds = array<i64: 1, 1>}, {transform_indices = @transform_7, window_bounds = array<i64: 1, 1, 64>}]} {
    %c0 = arith.constant 0 : index
    %c0_0 = arith.constant 0 : index
    %c0_1 = arith.constant 0 : index
    %0 = vector.load %arg2[%c0, %c0_0, %c0_1] : memref<1x4x64xf32, #tpu.memory_space<vmem>>, vector<1x4x64xf32>
    %1 = vector.shape_cast %0 : vector<1x4x64xf32> to vector<4x64xf32>
    %c0_2 = arith.constant 0 : index
    %c0_3 = arith.constant 0 : index
    %c0_4 = arith.constant 0 : index
    %2 = vector.load %arg3[%c0_2, %c0_3, %c0_4] : memref<1x4x64xf32, #tpu.memory_space<vmem>>, vector<1x4x64xf32>
    %3 = vector.shape_cast %2 : vector<1x4x64xf32> to vector<4x64xf32>
    %c0_5 = arith.constant 0 : index
    %c0_6 = arith.constant 0 : index
    %4 = vector.load %arg4[%c0_5, %c0_6] : memref<8x4xf32, #tpu.memory_space<vmem>>, vector<8x4xf32>
    %cst = arith.constant dense<0.000000e+00> : vector<8x64xf32>
    %5 = tpu.matmul %4, %1, %cst {dimension_numbers = #tpu.dot_dimension_numbers<[1], [0], [0], [1], [0, 0, 1, 1], [], []>} : vector<8x4xf32>, vector<4x64xf32>, vector<8x64xf32> -> vector<8x64xf32>
    %c0_7 = arith.constant 0 : index
    %c0_8 = arith.constant 0 : index
    %6 = vector.load %arg5[%c0_7, %c0_8] : memref<8x4xf32, #tpu.memory_space<vmem>>, vector<8x4xf32>
    %cst_9 = arith.constant dense<0.000000e+00> : vector<8x64xf32>
    %7 = tpu.matmul %6, %3, %cst_9 {dimension_numbers = #tpu.dot_dimension_numbers<[1], [0], [0], [1], [0, 0, 1, 1], [], []>} : vector<8x4xf32>, vector<4x64xf32>, vector<8x64xf32> -> vector<8x64xf32>
    %8 = arith.addf %5, %7 : vector<8x64xf32>
    %c0_10 = arith.constant 0 : index
    %c0_11 = arith.constant 0 : index
    %9 = vector.load %arg6[%c0_10, %c0_11] : memref<8x1xf32, #tpu.memory_space<vmem>>, vector<8x1xf32>
    %10 = vector.broadcast %9 : vector<8x1xf32> to vector<8x64xf32>
    %11 = arith.addf %8, %10 : vector<8x64xf32>
    %cst_12 = arith.constant 0.000000e+00 : f32
    %12 = vector.broadcast %cst_12 : f32 to vector<8x64xf32>
    %13 = arith.maximumf %11, %12 : vector<8x64xf32>
    %c0_13 = arith.constant 0 : index
    %c0_14 = arith.constant 0 : index
    %14 = vector.load %arg7[%c0_13, %c0_14] : memref<1x8xf32, #tpu.memory_space<vmem>>, vector<1x8xf32>
    %cst_15 = arith.constant dense<0.000000e+00> : vector<1x64xf32>
    %15 = tpu.matmul %14, %13, %cst_15 {dimension_numbers = #tpu.dot_dimension_numbers<[1], [0], [0], [1], [0, 0, 1, 1], [], []>} : vector<1x8xf32>, vector<8x64xf32>, vector<1x64xf32> -> vector<1x64xf32>
    %c0_16 = arith.constant 0 : index
    %c0_17 = arith.constant 0 : index
    %16 = vector.load %arg8[%c0_16, %c0_17] : memref<1x1xf32, #tpu.memory_space<vmem>>, vector<1x1xf32>
    %17 = vector.broadcast %16 : vector<1x1xf32> to vector<1x64xf32>
    %18 = arith.addf %15, %17 : vector<1x64xf32>
    %cst_18 = arith.constant 0.000000e+00 : f32
    %19 = vector.broadcast %cst_18 : f32 to vector<1x64xf32>
    %20 = arith.subf %19, %18 : vector<1x64xf32>
    %21 = math.exp %20 : vector<1x64xf32>
    %cst_19 = arith.constant 1.000000e+00 : f32
    %22 = vector.broadcast %cst_19 : f32 to vector<1x64xf32>
    %23 = arith.addf %22, %21 : vector<1x64xf32>
    %cst_20 = arith.constant 1.000000e+00 : f32
    %24 = vector.broadcast %cst_20 : f32 to vector<1x64xf32>
    %25 = arith.divf %24, %23 : vector<1x64xf32>
    %c0_21 = arith.constant 0 : index
    %c0_22 = arith.constant 0 : index
    %c0_23 = arith.constant 0 : index
    %26 = vector.load %arg9[%c0_21, %c0_22, %c0_23] : memref<1x1x64xf32, #tpu.memory_space<vmem>>, vector<1x1x64xf32>
    %27 = vector.shape_cast %26 : vector<1x1x64xf32> to vector<1x64xf32>
    %28 = vector.shape_cast %25 : vector<1x64xf32> to vector<1x1x64xf32>
    tpu.vector_store %arg9[%c0_21, %c0_22, %c0_23], %28 {strides = array<i32>} : memref<1x1x64xf32, #tpu.memory_space<vmem>>, vector<1x1x64xf32>,
    return
  }
  func.func @transform_0(%arg0: i32, %arg1: i32) -> (i32, i32, i32) {
    %c0_i32 = arith.constant 0 : i32
    %c0_i32_0 = arith.constant 0 : i32
    return %arg0, %c0_i32, %arg1 : i32, i32, i32
  }
  func.func @transform_1(%arg0: i32, %arg1: i32) -> (i32, i32, i32) {
    %c0_i32 = arith.constant 0 : i32
    %c0_i32_0 = arith.constant 0 : i32
    return %arg0, %c0_i32, %arg1 : i32, i32, i32
  }
  func.func @transform_2(%arg0: i32, %arg1: i32) -> (i32, i32) {
    %c0_i32 = arith.constant 0 : i32
    %c0_i32_0 = arith.constant 0 : i32
    %c0_i32_1 = arith.constant 0 : i32
    return %c0_i32, %c0_i32_0 : i32, i32
  }
  func.func @transform_3(%arg0: i32, %arg1: i32) -> (i32, i32) {
    %c0_i32 = arith.constant 0 : i32
    %c0_i32_0 = arith.constant 0 : i32
    %c0_i32_1 = arith.constant 0 : i32
    return %c0_i32, %c0_i32_0 : i32, i32
  }
  func.func @transform_4(%arg0: i32, %arg1: i32) -> (i32, i32) {
    %c0_i32 = arith.constant 0 : i32
    %c0_i32_0 = arith.constant 0 : i32
    %c0_i32_1 = arith.constant 0 : i32
    return %c0_i32, %c0_i32_0 : i32, i32
  }
  func.func @transform_5(%arg0: i32, %arg1: i32) -> (i32, i32) {
    %c0_i32 = arith.constant 0 : i32
    %c0_i32_0 = arith.constant 0 : i32
    %c0_i32_1 = arith.constant 0 : i32
    return %c0_i32, %c0_i32_0 : i32, i32
  }
  func.func @transform_6(%arg0: i32, %arg1: i32) -> (i32, i32) {
    %c0_i32 = arith.constant 0 : i32
    %c0_i32_0 = arith.constant 0 : i32
    %c0_i32_1 = arith.constant 0 : i32
    return %c0_i32, %c0_i32_0 : i32, i32
  }
  func.func @transform_7(%arg0: i32, %arg1: i32) -> (i32, i32, i32) {
    %c0_i32 = arith.constant 0 : i32
    %c0_i32_0 = arith.constant 0 : i32
    return %arg0, %c0_i32, %arg1 : i32, i32, i32
  }
}

</mosaic_0001>

<bundles_post_ra>
// kernel: tpu_custom_call.1
= control target key start
LH: loop header
LB: loop body
LE: loop exit
PB: predicated region body
PF: predicated region fallthrough
CT: control target
= control target key end

     0   :  { %s1030_s0 = inlined_call_operand.vmem [shape: f32[2,4,64], index: 0, kind: input, shape index: {}]   ;;  %s1031_s1 = inlined_call_operand.vmem [shape: f32[2,4,64], index: 1, kind: input, shape index: {}]   ;;  %s1032_s2 = inlined_call_operand.vmem [shape: f32[8,4], index: 2, kind: input, shape index: {}]   ;;  %s1033_s3 = inlined_call_operand.vmem [shape: f32[8,4], index: 3, kind: input, shape index: {}]   ;;  %s1034_s4 = inlined_call_operand.vmem [shape: f32[8,1], index: 4, kind: input, shape index: {}]   ;;  %s1035_s5 = inlined_call_operand.vmem [shape: f32[1,8], index: 5, kind: input, shape index: {}]   ;;  %s1036_s6 = inlined_call_operand.<no memory space> [shape: f32[1,1], index: 6, kind: input, shape index: {}]   ;;  %s1037_s7 = inlined_call_operand.hbm [shape: f32[2,1,64], index: 7, kind: output, shape index: {}]  }
   0x1   :  { %v12_v0 = vstv %s1036_s6 }
   0x2   :  { %13 = vst [vmem:[#allocation2] sm:$0x1] %v12_v0 }
   0x3   :  { %14 = vsyncpa [#allocation4], 0 }
   0x4   :  { %16 = vsyncpa [#allocation4 + $0x1], 0  ;;  %s907_s26 = smov 0   ;;  %s909_s27 = smov 0  }
   0x5   :  { %s911_s28 = smov 0   ;;  %s913_s29 = smov 0  }
   0x6   :  { %s915_s30 = smov 0   ;;  %s917_s8 = smov 0  }
   0x7 LB: > { %s683_s6 = sadd.s32 4294967295, %s858_s8   ;;  %s684_s9 = sadd.s32 4294967294, %s858_s8   ;;  %s858_s8 = sphi %s917_s8, %s22_s8   ;;  %s854_s30 = sphi %s915_s30, %s1044_s30   ;;  %s850_s29 = sphi %s913_s29, %s1043_s29   ;;  %s846_s28 = sphi %s911_s28, %s1042_s28   ;;  %s842_s27 = sphi %s909_s27, %s1041_s27   ;;  %s838_s26 = sphi %s907_s26, %s1040_s26  }
   0x8   : > { %s34_s10 = sadd.s32 1, %s854_s30  ;;  %s204_s11 = sadd.s32 1, %s846_s28 }
   0x9   : > { %p36_p0 = scmp.ge.s32.totalorder %s34_s10, 2  ;;  %p214_p1 = scmp.ne.s32.totalorder %s846_s28, %s842_s27 }
   0xa   : > { %p215_p2 = scmp.eq.s32.totalorder %s683_s6, 1  ;;  %p220_p3 = scmp.ne.s32.totalorder %s842_s27, %s838_s26 }
   0xb   : > { %s1046_s10 = smov (%p36_p0, %s34_s10), 0  ;;  %p221_p5 = scmp.eq.s32.totalorder %s684_s9, 1 }
   0xc   : > { %p947_p4 = por %p215_p2, %p214_p1  ;;  %s199_s13 = ssub.s32 %s854_s30, %s1046_s10 }
   0xd   : > { %p687_p6 = scmp.ge.s32.totalorder %s858_s8, 1  ;;  %p202_p7 = scmp.eq.s32.totalorder %s199_s13, 0 }
   0xe   : > { %p954_p8 = por %p221_p5, %p220_p3  ;;  %p274_p9 = scmp.lt.s32.totalorder %s858_s8, 3 }
   0xf   : > { %s960_s15 = scalar_select %p202_p7, %s846_s28, %s204_s11  }
  0x10   : > { %p275_p10 = pnand %p687_p6, %p274_p9 }
  0x11   : > { %p314_p11 = scmp.lt.s32.totalorder (!%p275_p10), %s850_s29, 1  ;;  %s863_s9 = smov (!%p275_p10), [#allocation3]  }
  0x12   : > { %278 = sbr.rel (%p275_p10) target bundleno = 472 (0x1d8), region = 48  ;;  %s786_s11 = sshll.u32 (!%p275_p10), %s863_s9, 4  ;;  %s787_s11 = int_to_ptr.vmem [resolvable:$false] %s786_s11 }
  0x17   : > { %v860_v1 = vmov 0.0   ;;  %v486_v2 = vld [vmem:[%s1034_s4] sm:$0xff]  ;;  %s315_s18 = scalar_select %p314_p11, %s850_s29, 1  ;;  %vm861_vm0 = vmmov 0   ;;  %v862_v3 = vmov 0   ;;  %vm336_vm1 = vcmask 1043456  }
  0x18   : > { %704 = vmatprep.subr.mxu0 %v860_v1  ;;  %709 = vmatprep.subr.mxu1 %v860_v1  ;;  %v331_v4 = vld [vmem:[%s1033_s3] sm:$0xff]  ;;  %vm332_vm2 = vcmask 31744   ;;  %vm505_vm3 = vcmask 64512   ;;  %v501_v18 = vlaneseq  ;;  %vm585_vm4 = vcmask 516096  }
  0x19   : > { %706 = vmatprep.mubr.msk.f32.mxu0 %vm861_vm0, %v860_v1  ;;  %711 = vmatprep.mubr.msk.f32.mxu1 %vm861_vm0, %v860_v1  ;;  %s688_s19 = sshll.u32 %s315_s18, 2  ;;  %v330_v5 = vld [vmem:[%s1032_s2] sm:$0xff]  ;;  %s312_s18 = sand.u32 1, %s842_s27  }
  0x1a   : > { %777 = vset.pattern.permute.xlu0 %v862_v3  ;;  %s327_s22 = scalar_lea.vmem %s1031_s1, %s688_s19  ;;  %s320_s25 = scalar_lea.vmem %s1030_s0, %s688_s19  ;;  %v495_v8 = vld [vmem:[#allocation2] sm:$0x1]  ;;  %v502_v19 = vshrl.u32 %v501_v18, 7 }
  0x1b   : > { %489 = vperm.xlu0 %777, %v486_v2   ;;  %v329_v6 = vld [vmem:[%s327_s22] sm:$0xf]  ;;  %s695_s19 = sshll.u32 %s850_s29, 4  ;;  %s313_s20 = scalar_lea.vmem [#allocation3], %s312_s18 }
  0x1c   : > { %v328_v7 = vld [vmem:[%s320_s25] sm:$0xf]  ;;  %705 = vmatpush3.msk.msra.mxu0 %vm336_vm1, %v329_v6  ;;  %v503_v20 = vsub.s32 0, %v502_v19  ;;  %s601_s21 = sshll.u32 %s313_s20, 4  ;;  %s990_s24 = scalar_lea.hbm %s1037_s7, %s695_s19  ;;  %s602_s21 = int_to_ptr.vmem [resolvable:$true] %s601_s21 }
  0x1d   : > { %710 = vmatpush3.msk.msra.mxu1 %vm336_vm1, %v328_v7  ;;  %707 = vmatmul.mubr.msk.f32.vlgmr.msra.gmra.mxu0 %vm332_vm2, %v331_v4  ;;  %v494_v17 = vld [vmem:[%s1035_s5] sm:$0x1]  ;;  %s588_s25 = scalar_lea.sflag [#allocation4], %s312_s18  ;;  %s782_s6 = scalar_lea.vmem %s602_s21, 16 }
  0x1e   : > { %712 = vmatmul.mubr.msk.f32.vlgmr.msra.gmra.mxu1 %vm332_vm2, %v330_v5  ;;  %714 = vmatprep.subr.mxu0 %v860_v1  ;;  %p783_p12 = scmp.ne.s32.totalorder %s602_s21, %s782_s6  ;;  %s788_s29 = scalar_lea.vmem %s787_s11, 32 }
  0x1f   : > { %498 = vperm.xlu0 %777, %v495_v8   ;;  %716 = vmatprep.mubr.msk.f32.mxu0 %vm861_vm0, %v860_v1  ;;  %p789_p1 = scmp.lt.s32.totalorder %s602_s21, %s787_s11  ;;  %p790_p2 = scmp.lt.s32.totalorder %s788_s29, %s782_s6 }
  0x20   : > { %p784_p13 = pnand %p783_p12, %p947_p4 }
  0x21   : > { %p791_p3 = por %p790_p2, %p789_p1 }
  0x22   : > { %p785_p0 = pneg %p784_p13 }
  0x24   : > { %p792_p5 = pnand %p791_p3, %p785_p0 }
  0x96   : > { %v490_v11 = vpop.permute.xlu0 %489 }
  0x9a   : > { %v499_v21 = vpop.permute.xlu0 %498 }
  0x9b   : > { %v504_v22 = vrot.slane %v499_v21, %v503_v20 }
  0xdd   : > { %v406_v9 = vpop.f32.mrf.mxu0 }
  0xde   : > { %v482_v10 = vpop.f32.mrf.mxu1 }
  0xdf   : > { %v483_v12 = vadd.f32 %v482_v10, %v406_v9  ;;  %v708_v13 = vpop.f32.mrf.mxu0 }
  0xe0   : > { %v713_v14 = vpop.f32.mrf.mxu1 }
  0xe1   : > { %v492_v15 = vadd.f32 %v490_v11, %v483_v12 }
  0xe3   : > { %v493_v16 = vmax.f32 %v492_v15, 0.0 }
  0xe5   : > { %715 = vmatpush3.msra.mxu0 %v493_v16 }
  0xe6   : > { %717 = vmatmul.mubr.msk.f32.vlgmr.msra.gmra.mxu0 %vm505_vm3, %v494_v17 }
 0x1a6   : > { %v575_v23 = vpop.f32.mrf.mxu0 }
 0x1a7   : > { %v576_v24 = vadd.f32 %v575_v23, %v504_v22 }
 0x1a8   : > { %v718_v25 = vpop.f32.mrf.mxu0 }
 0x1a9   : > { %v579_v26 = vsub.f32 0.0, %v576_v24 }
 0x1ab   : > { %v580_v27 = vmul.f32 1.442695, %v579_v26 }
 0x1ad   : > { %778 = vpow2.f32 %v580_v27 }
 0x1ba   : > { %v779_v28 = vpop.eup %778 }
 0x1bb   : > { %v582_v29 = vadd.f32 1.0, %v779_v28 }
 0x1bd   : > { %780 = vrcp.f32 %v582_v29 }
 0x1ca   : > { %v781_v30 = vpop.eup %780 }
 0x1cb   : > { %586 = vst.msk [vmem:[%s313_s20] sm:$0x1] %vm585_vm4, %v781_v30 }
 0x1cc   : > { %795 = shalt.err (!%p792_p5)
}
 0x1cd   : > { %s796_s13 = scalar_lea.hbm %s990_s24, 16  ;;  %s800_s18 = scalar_lea.hbm %s1037_s7, 32 }
 0x1ce   : > { %p797_p6 = scmp.ne.s32.totalorder %s990_s24, %s796_s13  ;;  %p801_p10 = scmp.lt.s32.totalorder %s990_s24, %s1037_s7 }
 0x1cf   : > { %p802_p11 = scmp.lt.s32.totalorder %s800_s18, %s796_s13 }
 0x1d0   : > { %p798_p7 = pnand %p797_p6, %p947_p4 }
 0x1d1   : > { %p803_p12 = por %p802_p11, %p801_p10 }
 0x1d2   : > { %p799_p9 = pneg %p798_p7 }
 0x1d4   : > { %p804_p13 = pnand %p803_p12, %p799_p9 }
 0x1d6   : > { %807 = shalt.err (!%p804_p13)
}
 0x1d7   : > { %719 = dma.vmem_to_hbm [thread:$0]  (%p947_p4), %s602_s21, 16, %s990_s24, %s588_s25  }
 0x1d8 PF: > { %p725_p0 = scmp.ge.s32.totalorder %s858_s8, 2  ;;  %s613_s22 = sand.u32 1, %s838_s26  }
 0x1d9   : > { %s614_s23 = scalar_lea.sflag [#allocation4], %s613_s22 }
 0x1da   : > { %p722_p1 = pnand %p725_p0, %p954_p8 }
 0x1dc   : > { %p723_p2 = pneg %p722_p1 }
 0x1de   : > { %833 = dma.done.wait (%p723_p2), %s614_s23, 16  }
 0x1df   : > { %835 = vsyncadd (%p723_p2), %s614_s23, 4294967280  ;;  %s22_s8 = sadd.s32 1, %s858_s8   ;;  %s1040_s26 = smov %s842_s27 }
 0x1e0   : > { %p19_p3 = scmp.ge.s32.totalorder %s22_s8, 4   ;;  %s1041_s27 = smov %s846_s28 }
 0x1e1   : > { %s1042_s28 = smov %s960_s15  ;;  %s1043_s29 = smov %s854_s30 }
 0x1e2   : > { %s1044_s30 = smov %s1046_s10  ;;  %21 = sbr.rel (!%p19_p3) target bundleno = 7 (0x7), region = 86 }
 0x1e7   :  { %618 = vsyncpa [#allocation4], 1 }
 0x1e8   :  { %620 = vsyncpa [#allocation4 + $0x1], 1 }

</bundles_post_ra>
